<compile_context>
chip_gen: v6e
topology: v6e:2x2x1
jax: 0.10.0
libtpu: 0.0.40
codegen_flags: <defaults>
</compile_context>

<pallas_src>
import functools

import jax
import jax.numpy as jnp
from jax.experimental import pallas as pl
from jax.experimental.pallas import tpu as pltpu

IN_DIM = 256
HID1 = 512
HID2 = 128
BN_EPS = 1e-5


def _round_up(n, m):
    return ((n + m - 1) // m) * m


def _mlp_kernel(x_ref, w1_ref, t1_ref, w2_ref, t2_ref, w3_ref, b3_ref, o_ref):
    # Cast the activation tile to bf16 in-kernel (VPU has slack; avoids a
    # separate wrapper-side HBM cast pass over x).
    x = x_ref[...].astype(jnp.bfloat16)

    # Layer 1: Linear(256,512) + folded BN(512) + ReLU  (bf16 MXU, f32 accum)
    h1 = jnp.dot(x, w1_ref[...], preferred_element_type=jnp.float32)
    h1 = jnp.maximum(h1 + t1_ref[...], 0.0)

    # Layer 2: Linear(512,128) + folded BN(128) + ReLU
    h2 = jnp.dot(h1.astype(jnp.bfloat16), w2_ref[...],
                 preferred_element_type=jnp.float32)
    h2 = jnp.maximum(h2 + t2_ref[...], 0.0)

    # Classifier: Linear(128, c_pad)
    o_ref[...] = (
        jnp.dot(h2.astype(jnp.bfloat16), w3_ref[...],
                preferred_element_type=jnp.float32) + b3_ref[...]
    ).astype(o_ref.dtype)


@functools.partial(jax.jit, static_argnames=("tile_b",))
def health_classifier_forward(x, params, *, tile_b=1024):
    """x: [B, 256] float32. params: see init_params. Returns [B, num_classes] f32."""
    B = x.shape[0]
    num_classes = params["w3"].shape[1]

    # --- operand preparation (one-time, tiny vs. the activation stream) ------
    # Fold BN (inference) + linear bias: the scale goes into the weight
    # columns *in f32 before the bf16 cast*; shift = beta + (bias - mean)*scale.
    def bn_fold(w, bias, gamma, beta, mean, var):
        scale = gamma / jnp.sqrt(var + BN_EPS)
        shift = beta + (bias - mean) * scale
        w_folded = (w.astype(jnp.float32) * scale[None, :]).astype(jnp.bfloat16)
        return w_folded, shift.reshape(1, -1).astype(jnp.float32)

    w1, t1 = bn_fold(params["w1"], params["b1"], params["g1"], params["be1"],
                     params["m1"], params["v1"])
    w2, t2 = bn_fold(params["w2"], params["b2"], params["g2"], params["be2"],
                     params["m2"], params["v2"])

    # Pad classifier output dim to a multiple of 128 for lane-dense stores.
    c_pad = _round_up(max(num_classes, 1), 128)
    w3 = jnp.pad(params["w3"], ((0, 0), (0, c_pad - num_classes))).astype(jnp.bfloat16)
    b3 = jnp.pad(params["b3"], (0, c_pad - num_classes)).reshape(1, -1).astype(jnp.float32)

    # --- batch tiling (no batch pad; Pallas masks the ragged last block) -----
    tb = min(int(tile_b), _round_up(B, 8))        # f32 sublane granularity
    if B >= 64:
        # Keep >= 2 grid steps so v7x's two TensorCores both get work.
        tb = min(tb, max(8, _round_up(pl.cdiv(B, 2), 8)))
    grid = (pl.cdiv(B, tb),)

    resident = lambda shape: pl.BlockSpec(shape, lambda i: (0, 0))
    in_specs = [
        pl.BlockSpec((tb, IN_DIM), lambda i: (i, 0)),   # x tile (f32, pipelined)
        resident((IN_DIM, HID1)),                       # w1 * bn_scale1 (bf16)
        resident((1, HID1)),                            # shift1 (f32)
        resident((HID1, HID2)),                         # w2 * bn_scale2 (bf16)
        resident((1, HID2)),                            # shift2 (f32)
        resident((HID2, c_pad)),                        # w3 (bf16)
        resident((1, c_pad)),                           # b3 (f32)
    ]
    out_specs = pl.BlockSpec((tb, c_pad), lambda i: (i, 0))

    flops = 2 * B * (IN_DIM * HID1 + HID1 * HID2 + HID2 * c_pad)
    bytes_accessed = (
        B * IN_DIM * 4                                  # x (f32, read in-kernel)
        + (w1.size + w2.size + w3.size) * 2             # bf16 weights
        + (t1.size + t2.size + b3.size) * 4             # f32 affines
        + B * c_pad * 4                                  # logits (f32)
    )

    # Scoped-VMEM budget: double-buffered x/out tiles + f32 intermediates +
    # (double-buffered) resident operands + headroom. Cap at v7x's 64 MiB.
    vmem_bytes = (
        2 * tb * IN_DIM * 4
        + 2 * tb * c_pad * 4
        + tb * (HID1 + HID2) * 4
        + 2 * (w1.size + w2.size + w3.size) * 2
        + 2 * (t1.size + t2.size + b3.size) * 4
        + (2 << 20)
    )
    vmem_limit = int(min(max(vmem_bytes, 32 << 20), 64 << 20))

    out = pl.pallas_call(
        _mlp_kernel,
        out_shape=jax.ShapeDtypeStruct((B, c_pad), jnp.float32),
        grid=grid,
        in_specs=in_specs,
        out_specs=out_specs,
        compiler_params=pltpu.CompilerParams(
            dimension_semantics=("parallel",),
            vmem_limit_bytes=vmem_limit),
        cost_estimate=pl.CostEstimate(
            flops=flops, transcendentals=0, bytes_accessed=bytes_accessed),
    )(x.astype(jnp.float32), w1, t1, w2, t2, w3, b3)

    return out[:, :num_classes]


def init_params(key, num_classes=10):
    """Deterministic init mimicking PyTorch defaults.

    Linear weights stored as [in_features, out_features] (transpose of torch);
    BN: gamma=1, beta=0, with non-trivial running mean/var so the fold is
    actually exercised.
    """
    def linear(k, fan_in, fan_out):
        kw, kb = jax.random.split(k)
        bound = 1.0 / jnp.sqrt(fan_in)
        w = jax.random.uniform(kw, (fan_in, fan_out), jnp.float32, -bound, bound)
        b = jax.random.uniform(kb, (fan_out,), jnp.float32, -bound, bound)
        return w, b

    k1, k2, k3, k4, k5 = jax.random.split(key, 5)
    w1, b1 = linear(k1, IN_DIM, HID1)
    w2, b2 = linear(k2, HID1, HID2)
    w3, b3 = linear(k3, HID2, num_classes)

    m1 = 0.1 * jax.random.normal(k4, (HID1,), jnp.float32)
    v1 = jax.random.uniform(k4, (HID1,), jnp.float32, 0.5, 1.5)
    m2 = 0.1 * jax.random.normal(k5, (HID2,), jnp.float32)
    v2 = jax.random.uniform(k5, (HID2,), jnp.float32, 0.5, 1.5)

    return {
        "w1": w1, "b1": b1,
        "g1": jnp.ones((HID1,), jnp.float32), "be1": jnp.zeros((HID1,), jnp.float32),
        "m1": m1, "v1": v1,
        "w2": w2, "b2": b2,
        "g2": jnp.ones((HID2,), jnp.float32), "be2": jnp.zeros((HID2,), jnp.float32),
        "m2": m2, "v2": v2,
        "w3": w3, "b3": b3,
    }


def _reference(x, p):
    """Pure-JAX reference: same bf16-MXU / f32-accumulation scheme, BN unfolded."""
    def bn(z, g, be, m, v):
        return (z - m) / jnp.sqrt(v + BN_EPS) * g + be

    h1 = jnp.dot(x.astype(jnp.bfloat16), p["w1"].astype(jnp.bfloat16),
                 preferred_element_type=jnp.float32) + p["b1"]
    h1 = jnp.maximum(bn(h1, p["g1"], p["be1"], p["m1"], p["v1"]), 0.0)
    h2 = jnp.dot(h1.astype(jnp.bfloat16), p["w2"].astype(jnp.bfloat16),
                 preferred_element_type=jnp.float32) + p["b2"]
    h2 = jnp.maximum(bn(h2, p["g2"], p["be2"], p["m2"], p["v2"]), 0.0)
    return jnp.dot(h2.astype(jnp.bfloat16), p["w3"].astype(jnp.bfloat16),
                   preferred_element_type=jnp.float32) + p["b3"]


if __name__ == "__main__":
    key = jax.random.PRNGKey(0)
    kx, kp = jax.random.split(key)

    B = 8
    num_classes = 10
    x = jax.random.normal(kx, (B, IN_DIM), jnp.float32)
    params = init_params(kp, num_classes=num_classes)

    out = health_classifier_forward(x, params)
    out = jax.block_until_ready(out)

    ref = _reference(x, params)
    assert out.shape == (B, num_classes), out.shape
    # 2e-2 tolerance: the kernel folds the BN scale into the bf16 weights
    # (one extra rounding site vs. the unfolded reference), everything else
    # matches the reference's bf16/f32 casting scheme.
    assert jnp.allclose(out, ref, atol=2e-2, rtol=2e-2), (
        float(jnp.max(jnp.abs(out - ref)))
    )
    print("KERNEL_OK")
</pallas_src>

<mosaic_0001>
module attributes {stable_mosaic.version = 11 : i64} {
  func.func @_mlp_kernel(%arg0: i32, %arg1: memref<8x256xf32, #tpu.memory_space<vmem>>, %arg2: memref<256x512xbf16, #tpu.memory_space<vmem>>, %arg3: memref<1x512xf32, #tpu.memory_space<vmem>>, %arg4: memref<512x128xbf16, #tpu.memory_space<vmem>>, %arg5: memref<1x128xf32, #tpu.memory_space<vmem>>, %arg6: memref<128x128xbf16, #tpu.memory_space<vmem>>, %arg7: memref<1x128xf32, #tpu.memory_space<vmem>>, %arg8: memref<8x128xf32, #tpu.memory_space<vmem>>) attributes {dimension_semantics = [#tpu.dimension_semantics<parallel>], iteration_bounds = array<i64: 1>, scalar_prefetch = 0 : i64, scratch_operands = 0 : i64, tpu.core_type = #tpu.core_type<tc>, window_params = [{transform_indices = @transform_0, window_bounds = array<i64: 8, 256>}, {pipeline_mode = #tpu.pipeline_mode<synchronous>, transform_indices = @transform_1, window_bounds = array<i64: 256, 512>}, {pipeline_mode = #tpu.pipeline_mode<synchronous>, transform_indices = @transform_2, window_bounds = array<i64: 1, 512>}, {pipeline_mode = #tpu.pipeline_mode<synchronous>, transform_indices = @transform_3, window_bounds = array<i64: 512, 128>}, {pipeline_mode = #tpu.pipeline_mode<synchronous>, transform_indices = @transform_4, window_bounds = array<i64: 1, 128>}, {pipeline_mode = #tpu.pipeline_mode<synchronous>, transform_indices = @transform_5, window_bounds = array<i64: 128, 128>}, {pipeline_mode = #tpu.pipeline_mode<synchronous>, transform_indices = @transform_6, window_bounds = array<i64: 1, 128>}, {transform_indices = @transform_7, window_bounds = array<i64: 8, 128>}]} {
    %c0 = arith.constant 0 : index
    %c0_0 = arith.constant 0 : index
    %0 = vector.load %arg1[%c0, %c0_0] : memref<8x256xf32, #tpu.memory_space<vmem>>, vector<8x256xf32>
    %1 = arith.truncf %0 : vector<8x256xf32> to vector<8x256xbf16>
    %c0_1 = arith.constant 0 : index
    %c0_2 = arith.constant 0 : index
    %2 = vector.load %arg2[%c0_1, %c0_2] : memref<256x512xbf16, #tpu.memory_space<vmem>>, vector<256x512xbf16>
    %cst = arith.constant dense<0.000000e+00> : vector<8x512xf32>
    %3 = tpu.matmul %1, %2, %cst {dimension_numbers = #tpu.dot_dimension_numbers<[1], [0], [0], [1], [0, 0, 1, 1], [], []>} : vector<8x256xbf16>, vector<256x512xbf16>, vector<8x512xf32> -> vector<8x512xf32>
    %c0_3 = arith.constant 0 : index
    %c0_4 = arith.constant 0 : index
    %4 = vector.load %arg3[%c0_3, %c0_4] : memref<1x512xf32, #tpu.memory_space<vmem>>, vector<1x512xf32>
    %5 = vector.broadcast %4 : vector<1x512xf32> to vector<8x512xf32>
    %6 = arith.addf %3, %5 : vector<8x512xf32>
    %cst_5 = arith.constant 0.000000e+00 : f32
    %7 = vector.broadcast %cst_5 : f32 to vector<8x512xf32>
    %8 = arith.maximumf %6, %7 : vector<8x512xf32>
    %9 = arith.truncf %8 : vector<8x512xf32> to vector<8x512xbf16>
    %c0_6 = arith.constant 0 : index
    %c0_7 = arith.constant 0 : index
    %10 = vector.load %arg4[%c0_6, %c0_7] : memref<512x128xbf16, #tpu.memory_space<vmem>>, vector<512x128xbf16>
    %cst_8 = arith.constant dense<0.000000e+00> : vector<8x128xf32>
    %11 = tpu.matmul %9, %10, %cst_8 {dimension_numbers = #tpu.dot_dimension_numbers<[1], [0], [0], [1], [0, 0, 1, 1], [], []>} : vector<8x512xbf16>, vector<512x128xbf16>, vector<8x128xf32> -> vector<8x128xf32>
    %c0_9 = arith.constant 0 : index
    %c0_10 = arith.constant 0 : index
    %12 = vector.load %arg5[%c0_9, %c0_10] : memref<1x128xf32, #tpu.memory_space<vmem>>, vector<1x128xf32>
    %13 = vector.broadcast %12 : vector<1x128xf32> to vector<8x128xf32>
    %14 = arith.addf %11, %13 : vector<8x128xf32>
    %cst_11 = arith.constant 0.000000e+00 : f32
    %15 = vector.broadcast %cst_11 : f32 to vector<8x128xf32>
    %16 = arith.maximumf %14, %15 : vector<8x128xf32>
    %17 = arith.truncf %16 : vector<8x128xf32> to vector<8x128xbf16>
    %c0_12 = arith.constant 0 : index
    %c0_13 = arith.constant 0 : index
    %18 = vector.load %arg6[%c0_12, %c0_13] : memref<128x128xbf16, #tpu.memory_space<vmem>>, vector<128x128xbf16>
    %cst_14 = arith.constant dense<0.000000e+00> : vector<8x128xf32>
    %19 = tpu.matmul %17, %18, %cst_14 {dimension_numbers = #tpu.dot_dimension_numbers<[1], [0], [0], [1], [0, 0, 1, 1], [], []>} : vector<8x128xbf16>, vector<128x128xbf16>, vector<8x128xf32> -> vector<8x128xf32>
    %c0_15 = arith.constant 0 : index
    %c0_16 = arith.constant 0 : index
    %20 = vector.load %arg7[%c0_15, %c0_16] : memref<1x128xf32, #tpu.memory_space<vmem>>, vector<1x128xf32>
    %21 = vector.broadcast %20 : vector<1x128xf32> to vector<8x128xf32>
    %22 = arith.addf %19, %21 : vector<8x128xf32>
    %c0_17 = arith.constant 0 : index
    %c0_18 = arith.constant 0 : index
    %23 = vector.load %arg8[%c0_17, %c0_18] : memref<8x128xf32, #tpu.memory_space<vmem>>, vector<8x128xf32>
    tpu.vector_store %arg8[%c0_17, %c0_18], %22 {strides = array<i32>} : memref<8x128xf32, #tpu.memory_space<vmem>>, vector<8x128xf32>,
    return
  }
  func.func @transform_0(%arg0: i32) -> (i32, i32) {
    %c0_i32 = arith.constant 0 : i32
    %c0_i32_0 = arith.constant 0 : i32
    return %arg0, %c0_i32 : i32, i32
  }
  func.func @transform_1(%arg0: i32) -> (i32, i32) {
    %c0_i32 = arith.constant 0 : i32
    %c0_i32_0 = arith.constant 0 : i32
    %c0_i32_1 = arith.constant 0 : i32
    return %c0_i32, %c0_i32_0 : i32, i32
  }
  func.func @transform_2(%arg0: i32) -> (i32, i32) {
    %c0_i32 = arith.constant 0 : i32
    %c0_i32_0 = arith.constant 0 : i32
    %c0_i32_1 = arith.constant 0 : i32
    return %c0_i32, %c0_i32_0 : i32, i32
  }
  func.func @transform_3(%arg0: i32) -> (i32, i32) {
    %c0_i32 = arith.constant 0 : i32
    %c0_i32_0 = arith.constant 0 : i32
    %c0_i32_1 = arith.constant 0 : i32
    return %c0_i32, %c0_i32_0 : i32, i32
  }
  func.func @transform_4(%arg0: i32) -> (i32, i32) {
    %c0_i32 = arith.constant 0 : i32
    %c0_i32_0 = arith.constant 0 : i32
    %c0_i32_1 = arith.constant 0 : i32
    return %c0_i32, %c0_i32_0 : i32, i32
  }
  func.func @transform_5(%arg0: i32) -> (i32, i32) {
    %c0_i32 = arith.constant 0 : i32
    %c0_i32_0 = arith.constant 0 : i32
    %c0_i32_1 = arith.constant 0 : i32
    return %c0_i32, %c0_i32_0 : i32, i32
  }
  func.func @transform_6(%arg0: i32) -> (i32, i32) {
    %c0_i32 = arith.constant 0 : i32
    %c0_i32_0 = arith.constant 0 : i32
    %c0_i32_1 = arith.constant 0 : i32
    return %c0_i32, %c0_i32_0 : i32, i32
  }
  func.func @transform_7(%arg0: i32) -> (i32, i32) {
    %c0_i32 = arith.constant 0 : i32
    %c0_i32_0 = arith.constant 0 : i32
    return %arg0, %c0_i32 : i32, i32
  }
}

</mosaic_0001>

<bundles_post_ra>
// kernel: health_classifier_forward.1
= control target key start
LH: loop header
LB: loop body
LE: loop exit
PB: predicated region body
PF: predicated region fallthrough
CT: control target
= control target key end

     0   :  { %s1712_s0 = inlined_call_operand.vmem [shape: f32[8,256], index: 0, kind: input, shape index: {}]   ;;  %s1713_s1 = inlined_call_operand.vmem [shape: bf16[256,512], index: 1, kind: input, shape index: {}]   ;;  %s1714_s2 = inlined_call_operand.vmem [shape: f32[1,512], index: 2, kind: input, shape index: {}]   ;;  %s1715_s3 = inlined_call_operand.vmem [shape: bf16[512,128], index: 3, kind: input, shape index: {}]   ;;  %s1716_s4 = inlined_call_operand.vmem [shape: f32[1,128], index: 4, kind: input, shape index: {}]   ;;  %s1717_s5 = inlined_call_operand.vmem [shape: bf16[128,128], index: 5, kind: input, shape index: {}]   ;;  %s1718_s6 = inlined_call_operand.vmem [shape: f32[1,128], index: 6, kind: input, shape index: {}]   ;;  %s1719_s7 = inlined_call_operand.hbm [shape: f32[8,128], index: 7, kind: output, shape index: {}]  }
   0x1   :  { %v1181_v0 = vld [vmem:[%s1713_s1 + $0xe4] ss:$16 sps:$4 sm:$0xff]   ;;  %v1183_v1 = vld [vmem:[%s1713_s1 + $0xec] ss:$16 sps:$4 sm:$0xff]   ;;  %v1185_v2 = vld [vmem:[%s1713_s1 + $0xe0] ss:$16 sps:$4 sm:$0xff]  }
   0x2   :  { %438 = vmatprep.subr.bf16.mxu0 %v1181_v0  ;;  %v1186_v3 = vld [vmem:[%s1713_s1 + $0xe8] ss:$16 sps:$4 sm:$0xff]   ;;  %479 = vmatprep.subr.bf16.mxu1 %v1183_v1  ;;  %v1187_v4 = vld [vmem:[%s1713_s1 + $0xc4] ss:$16 sps:$4 sm:$0xff]   ;;  %v1189_v5 = vld [vmem:[%s1713_s1 + $0xcc] ss:$16 sps:$4 sm:$0xff]  }
   0x3   :  { %439 = vmatpush1.bf16.msra.mxu0 %v1185_v2  ;;  %480 = vmatpush1.bf16.msra.mxu1 %v1186_v3  ;;  %v1191_v6 = vld [vmem:[%s1713_s1 + $0xc0] ss:$16 sps:$4 sm:$0xff]   ;;  %v1192_v7 = vld [vmem:[%s1713_s1 + $0xc8] ss:$16 sps:$4 sm:$0xff]   ;;  %v1193_v8 = vld [vmem:[%s1713_s1 + $0xa4] ss:$16 sps:$4 sm:$0xff]  }
   0x4   :  { %440 = vmatprep.subr.bf16.mxu0 %v1187_v4  ;;  %481 = vmatprep.subr.bf16.mxu1 %v1189_v5  ;;  %v1195_v9 = vld [vmem:[%s1713_s1 + $0xac] ss:$16 sps:$4 sm:$0xff]   ;;  %v1197_v10 = vld [vmem:[%s1713_s1 + $0xa0] ss:$16 sps:$4 sm:$0xff]   ;;  %v1198_v11 = vld [vmem:[%s1713_s1 + $0xa8] ss:$16 sps:$4 sm:$0xff]  }
   0x5   :  { %v1199_v12 = vld [vmem:[%s1713_s1 + $0x84] ss:$16 sps:$4 sm:$0xff]   ;;  %v1201_v13 = vld [vmem:[%s1713_s1 + $0x8c] ss:$16 sps:$4 sm:$0xff]   ;;  %v1203_v14 = vld [vmem:[%s1713_s1 + $0x80] ss:$16 sps:$4 sm:$0xff]  }
   0x6   :  { %v1204_v15 = vld [vmem:[%s1713_s1 + $0x88] ss:$16 sps:$4 sm:$0xff]   ;;  %v1205_v16 = vld [vmem:[%s1713_s1 + $0x64] ss:$16 sps:$4 sm:$0xff]   ;;  %v1207_v17 = vld [vmem:[%s1713_s1 + $0x6c] ss:$16 sps:$4 sm:$0xff]  }
   0x7   :  { %441 = vmatpush1.bf16.msra.mxu0 %v1191_v6  ;;  %482 = vmatpush1.bf16.msra.mxu1 %v1192_v7  ;;  %v1209_v18 = vld [vmem:[%s1713_s1 + $0x60] ss:$16 sps:$4 sm:$0xff]   ;;  %v1210_v19 = vld [vmem:[%s1713_s1 + $0x68] ss:$16 sps:$4 sm:$0xff]   ;;  %v1211_v20 = vld [vmem:[%s1713_s1 + $0x44] ss:$16 sps:$4 sm:$0xff]  }
   0x8   :  { %442 = vmatprep.subr.bf16.mxu0 %v1193_v8  ;;  %483 = vmatprep.subr.bf16.mxu1 %v1195_v9  ;;  %v1213_v21 = vld [vmem:[%s1713_s1 + $0x4c] ss:$16 sps:$4 sm:$0xff]   ;;  %v1215_v22 = vld [vmem:[%s1713_s1 + $0x40] ss:$16 sps:$4 sm:$0xff]   ;;  %v1216_v23 = vld [vmem:[%s1713_s1 + $0x48] ss:$16 sps:$4 sm:$0xff]  }
   0x9   :  { %v1217_v24 = vld [vmem:[%s1713_s1 + $0x24] ss:$16 sps:$4 sm:$0xff]   ;;  %v1219_v25 = vld [vmem:[%s1713_s1 + $0x2c] ss:$16 sps:$4 sm:$0xff]   ;;  %v1221_v26 = vld [vmem:[%s1713_s1 + $0x20] ss:$16 sps:$4 sm:$0xff]  }
   0xa   :  { %v1222_v27 = vld [vmem:[%s1713_s1 + $0x28] ss:$16 sps:$4 sm:$0xff]   ;;  %v1223_v28 = vld [vmem:[%s1713_s1 + $0x4] ss:$16 sps:$4 sm:$0xff]   ;;  %v1225_v29 = vld [vmem:[%s1713_s1 + $0xc] ss:$16 sps:$4 sm:$0xff]  }
   0xb   :  { %443 = vmatpush1.bf16.msra.mxu0 %v1197_v10  ;;  %484 = vmatpush1.bf16.msra.mxu1 %v1198_v11  ;;  %v1227_v30 = vld [vmem:[%s1713_s1] ss:$16 sps:$4 sm:$0xff]   ;;  %v1228_v31 = vld [vmem:[%s1713_s1 + $0x8] ss:$16 sps:$4 sm:$0xff]   ;;  %v1229_v32 = vld [vmem:[%s1713_s1 + $0x1e4] ss:$16 sps:$4 sm:$0xff]  }
   0xc   :  { %444 = vmatprep.subr.bf16.mxu0 %v1199_v12  ;;  %485 = vmatprep.subr.bf16.mxu1 %v1201_v13  ;;  %v1231_v33 = vld [vmem:[%s1713_s1 + $0x1ec] ss:$16 sps:$4 sm:$0xff]   ;;  %v1233_v34 = vld [vmem:[%s1713_s1 + $0x1e0] ss:$16 sps:$4 sm:$0xff]   ;;  %v1234_v35 = vld [vmem:[%s1713_s1 + $0x1e8] ss:$16 sps:$4 sm:$0xff]  }
   0xd   :  { %v1235_v36 = vld [vmem:[%s1713_s1 + $0x1c4] ss:$16 sps:$4 sm:$0xff]   ;;  %v1237_v37 = vld [vmem:[%s1713_s1 + $0x1cc] ss:$16 sps:$4 sm:$0xff]   ;;  %v1239_v38 = vld [vmem:[%s1713_s1 + $0x1c0] ss:$16 sps:$4 sm:$0xff]  }
   0xe   :  { %v1240_v39 = vld [vmem:[%s1713_s1 + $0x1c8] ss:$16 sps:$4 sm:$0xff]   ;;  %v1241_v40 = vld [vmem:[%s1713_s1 + $0x1a4] ss:$16 sps:$4 sm:$0xff]   ;;  %v1243_v41 = vld [vmem:[%s1713_s1 + $0x1ac] ss:$16 sps:$4 sm:$0xff]  }
   0xf   :  { %445 = vmatpush1.bf16.msra.mxu0 %v1203_v14  ;;  %486 = vmatpush1.bf16.msra.mxu1 %v1204_v15  ;;  %v1245_v42 = vld [vmem:[%s1713_s1 + $0x1a0] ss:$16 sps:$4 sm:$0xff]   ;;  %v1246_v43 = vld [vmem:[%s1713_s1 + $0x1a8] ss:$16 sps:$4 sm:$0xff]   ;;  %v1247_v44 = vld [vmem:[%s1713_s1 + $0x184] ss:$16 sps:$4 sm:$0xff]  }
  0x10   :  { %446 = vmatprep.subr.bf16.mxu0 %v1205_v16  ;;  %487 = vmatprep.subr.bf16.mxu1 %v1207_v17  ;;  %v1249_v45 = vld [vmem:[%s1713_s1 + $0x18c] ss:$16 sps:$4 sm:$0xff]   ;;  %v1251_v46 = vld [vmem:[%s1713_s1 + $0x180] ss:$16 sps:$4 sm:$0xff]   ;;  %v1252_v48 = vld [vmem:[%s1713_s1 + $0x188] ss:$16 sps:$4 sm:$0xff]  }
  0x11   :  { %v29_v47 = vld [vmem:[%s1712_s0 + $0x8] sm:$0xff]  ;;  %v1253_v50 = vld [vmem:[%s1713_s1 + $0x164] ss:$16 sps:$4 sm:$0xff]   ;;  %v1257_v52 = vld [vmem:[%s1713_s1 + $0x160] ss:$16 sps:$4 sm:$0xff]  }
  0x12   :  { %v31_v49 = vpack.c.bf16 %v29_v47, %v29_v47  ;;  %v1255_v51 = vld [vmem:[%s1713_s1 + $0x16c] ss:$16 sps:$4 sm:$0xff]   ;;  %v1258_v53 = vld [vmem:[%s1713_s1 + $0x168] ss:$16 sps:$4 sm:$0xff]   ;;  %v1259_v54 = vld [vmem:[%s1713_s1 + $0x144] ss:$16 sps:$4 sm:$0xff]  }
  0x13   :  { %447 = vmatpush1.bf16.msra.mxu0 %v1209_v18  ;;  %488 = vmatpush1.bf16.msra.mxu1 %v1210_v19  ;;  %v1261_v55 = vld [vmem:[%s1713_s1 + $0x14c] ss:$16 sps:$4 sm:$0xff]   ;;  %v1263_v56 = vld [vmem:[%s1713_s1 + $0x140] ss:$16 sps:$4 sm:$0xff]   ;;  %v1264_v57 = vld [vmem:[%s1713_s1 + $0x148] ss:$16 sps:$4 sm:$0xff]  }
  0x14   :  { %448 = vmatprep.subr.bf16.mxu0 %v1211_v20  ;;  %489 = vmatprep.subr.bf16.mxu1 %v1213_v21  ;;  %v1265_v58 = vld [vmem:[%s1713_s1 + $0x124] ss:$16 sps:$4 sm:$0xff]   ;;  %v1267_v59 = vld [vmem:[%s1713_s1 + $0x12c] ss:$16 sps:$4 sm:$0xff]   ;;  %v1269_v60 = vld [vmem:[%s1713_s1 + $0x120] ss:$16 sps:$4 sm:$0xff]  }
  0x15   :  { %470 = vmatprep.mubr.bf16.mxu0 %v31_v49  ;;  %511 = vmatprep.mubr.bf16.mxu1 %v31_v49  ;;  %v1270_v61 = vld [vmem:[%s1713_s1 + $0x128] ss:$16 sps:$4 sm:$0xff]   ;;  %v1271_v62 = vld [vmem:[%s1713_s1 + $0x104] ss:$16 sps:$4 sm:$0xff]   ;;  %v1273_v63 = vld [vmem:[%s1713_s1 + $0x10c] ss:$16 sps:$4 sm:$0xff]  }
  0x16   :  { %v1275_v0 = vld [vmem:[%s1713_s1 + $0x100] ss:$16 sps:$4 sm:$0xff]   ;;  %v1276_v1 = vld [vmem:[%s1713_s1 + $0x108] ss:$16 sps:$4 sm:$0xff]  }
  0x17   :  { %449 = vmatpush1.bf16.msra.mxu0 %v1215_v22  ;;  %490 = vmatpush1.bf16.msra.mxu1 %v1216_v23  ;;  %v28_v2 = vld [vmem:[%s1712_s0] sm:$0xff]  ;;  %v1277_v3 = vld [vmem:[%s1715_s3 + $0x78] sm:$0xff]   ;;  %v1281_v8 = vld [vmem:[%s1715_s3 + $0x70] sm:$0xff]  }
  0x18   :  { %450 = vmatprep.subr.bf16.mxu0 %v1217_v24  ;;  %491 = vmatprep.subr.bf16.mxu1 %v1219_v25  ;;  %v1278_v4 = vld [vmem:[%s1715_s3 + $0xf8] sm:$0xff]   ;;  %v30_v6 = vpack.c.bf16 %v28_v2, %v28_v2  ;;  %v1282_v9 = vld [vmem:[%s1715_s3 + $0xf0] sm:$0xff]   ;;  %v1285_v12 = vld [vmem:[%s1715_s3 + $0x68] sm:$0xff]  }
  0x19   :  { %v1279_v5 = vld [vmem:[%s1715_s3 + $0x38] sm:$0xff]   ;;  %v1283_v10 = vld [vmem:[%s1715_s3 + $0x30] sm:$0xff]   ;;  %v1286_v13 = vld [vmem:[%s1715_s3 + $0xe8] sm:$0xff]  }
  0x1a   :  { %v1280_v7 = vld [vmem:[%s1715_s3 + $0xb8] sm:$0xff]   ;;  %v1284_v11 = vld [vmem:[%s1715_s3 + $0xb0] sm:$0xff]   ;;  %v1287_v14 = vld [vmem:[%s1715_s3 + $0x28] sm:$0xff]  }
  0x1b   :  { %451 = vmatpush1.bf16.msra.mxu0 %v1221_v26  ;;  %492 = vmatpush1.bf16.msra.mxu1 %v1222_v27  ;;  %v1288_v15 = vld [vmem:[%s1715_s3 + $0xa8] sm:$0xff]   ;;  %v1289_v16 = vld [vmem:[%s1715_s3 + $0x60] sm:$0xff]   ;;  %v1293_v20 = vld [vmem:[%s1715_s3 + $0x58] sm:$0xff]  }
  0x1c   :  { %452 = vmatprep.subr.bf16.mxu0 %v1223_v28  ;;  %493 = vmatprep.subr.bf16.mxu1 %v1225_v29  ;;  %v1290_v17 = vld [vmem:[%s1715_s3 + $0xe0] sm:$0xff]   ;;  %v1294_v21 = vld [vmem:[%s1715_s3 + $0xd8] sm:$0xff]  }
  0x1d   :  { %v1291_v18 = vld [vmem:[%s1715_s3 + $0x20] sm:$0xff]  }
  0x1e   :  { %v1292_v19 = vld [vmem:[%s1715_s3 + $0xa0] sm:$0xff]  }
  0x1f   :  { %453 = vmatpush1.bf16.msra.mxu0 %v1227_v30  ;;  %494 = vmatpush1.bf16.msra.mxu1 %v1228_v31 }
  0x20   :  { %454 = vmatprep.subr.bf16.mxu0 %v1229_v32  ;;  %495 = vmatprep.subr.bf16.mxu1 %v1231_v33 }
  0x23   :  { %455 = vmatpush2.bf16.msra.mxu0 %v1233_v34  ;;  %496 = vmatpush2.bf16.msra.mxu1 %v1234_v35 }
  0x24   :  { %456 = vmatprep.subr.bf16.mxu0 %v1235_v36  ;;  %497 = vmatprep.subr.bf16.mxu1 %v1237_v37 }
  0x27   :  { %457 = vmatpush2.bf16.msra.mxu0 %v1239_v38  ;;  %498 = vmatpush2.bf16.msra.mxu1 %v1240_v39 }
  0x28   :  { %458 = vmatprep.subr.bf16.mxu0 %v1241_v40  ;;  %499 = vmatprep.subr.bf16.mxu1 %v1243_v41 }
  0x2b   :  { %459 = vmatpush2.bf16.msra.mxu0 %v1245_v42  ;;  %500 = vmatpush2.bf16.msra.mxu1 %v1246_v43 }
  0x2c   :  { %460 = vmatprep.subr.bf16.mxu0 %v1247_v44  ;;  %501 = vmatprep.subr.bf16.mxu1 %v1249_v45 }
  0x2f   :  { %461 = vmatpush2.bf16.msra.mxu0 %v1251_v46  ;;  %502 = vmatpush2.bf16.msra.mxu1 %v1252_v48 }
  0x30   :  { %462 = vmatprep.subr.bf16.mxu0 %v1253_v50  ;;  %503 = vmatprep.subr.bf16.mxu1 %v1255_v51 }
  0x33   :  { %463 = vmatpush2.bf16.msra.mxu0 %v1257_v52  ;;  %504 = vmatpush2.bf16.msra.mxu1 %v1258_v53 }
  0x34   :  { %464 = vmatprep.subr.bf16.mxu0 %v1259_v54  ;;  %505 = vmatprep.subr.bf16.mxu1 %v1261_v55 }
  0x37   :  { %465 = vmatpush2.bf16.msra.mxu0 %v1263_v56  ;;  %506 = vmatpush2.bf16.msra.mxu1 %v1264_v57 }
  0x38   :  { %466 = vmatprep.subr.bf16.mxu0 %v1265_v58  ;;  %507 = vmatprep.subr.bf16.mxu1 %v1267_v59 }
  0x3b   :  { %467 = vmatpush2.bf16.msra.mxu0 %v1269_v60  ;;  %508 = vmatpush2.bf16.msra.mxu1 %v1270_v61 }
  0x3c   :  { %468 = vmatprep.subr.bf16.mxu0 %v1271_v62  ;;  %509 = vmatprep.subr.bf16.mxu1 %v1273_v63 }
  0x3f   :  { %469 = vmatpush2.bf16.msra.mxu0 %v1275_v0  ;;  %510 = vmatpush2.bf16.msra.mxu1 %v1276_v1 }
  0x40   :  { %1105 = vmatprep.subr.bf16.mxu0 %v1277_v3  ;;  %1127 = vmatprep.subr.bf16.mxu1 %v1278_v4 }
  0x42   :  { %471 = vmatmul.mubr.bf16.vlgmr.msra.gmra.mxu0 %v30_v6  ;;  %512 = vmatmul.mubr.bf16.vlgmr.msra.gmra.mxu1 %v30_v6 }
  0x43   :  { %1106 = vmatpush3.bf16.msra.mxu0 %v1279_v5  ;;  %1128 = vmatpush3.bf16.msra.mxu1 %v1280_v7 }
  0x44   :  { %1107 = vmatprep.subr.bf16.mxu0 %v1281_v8  ;;  %1129 = vmatprep.subr.bf16.mxu1 %v1282_v9 }
  0x47   :  { %1108 = vmatpush3.bf16.msra.mxu0 %v1283_v10  ;;  %1130 = vmatpush3.bf16.msra.mxu1 %v1284_v11 }
  0x48   :  { %1109 = vmatprep.subr.bf16.mxu0 %v1285_v12  ;;  %1131 = vmatprep.subr.bf16.mxu1 %v1286_v13 }
  0x4b   :  { %1110 = vmatpush3.bf16.msra.mxu0 %v1287_v14  ;;  %1132 = vmatpush3.bf16.msra.mxu1 %v1288_v15 }
  0x4c   :  { %1111 = vmatprep.subr.bf16.mxu0 %v1289_v16  ;;  %1133 = vmatprep.subr.bf16.mxu1 %v1290_v17 }
  0x4d   :  { %12 = vsyncpa [#allocation3], 0  ;;  %v1295_v22 = vld [vmem:[%s1715_s3 + $0x18] sm:$0xff]   ;;  %v1297_v24 = vld [vmem:[%s1715_s3 + $0x50] sm:$0xff]   ;;  %v1339_v36 = vmov 0.0   ;;  %v98_v37 = vlaneseq  ;;  %vm1340_vm0 = vmmov 0  }
  0x4e   :  { %v1296_v23 = vld [vmem:[%s1715_s3 + $0x98] sm:$0xff]   ;;  %v1298_v25 = vld [vmem:[%s1715_s3 + $0xd0] sm:$0xff]   ;;  %v1301_v28 = vld [vmem:[%s1715_s3 + $0x48] sm:$0xff]   ;;  %s1341_s0 = smov [#allocation2]  }
  0x4f   :  { %1112 = vmatpush3.bf16.msra.mxu0 %v1291_v18  ;;  %1134 = vmatpush3.bf16.msra.mxu1 %v1292_v19  ;;  %v1299_v26 = vld [vmem:[%s1715_s3 + $0x10] sm:$0xff]   ;;  %v1302_v29 = vld [vmem:[%s1715_s3 + $0xc8] sm:$0xff]   ;;  %v1305_v32 = vld [vmem:[%s1715_s3 + $0x40] sm:$0xff]   ;;  %v99_v38 = vshrl.u32 %v98_v37, 7  ;;  %s991_s25 = sshll.u32 %s1341_s0, 4  ;;  %s992_s25 = int_to_ptr.vmem [resolvable:$true] %s991_s25 }
  0x50   :  { %1113 = vmatprep.subr.bf16.mxu0 %v1293_v20  ;;  %1135 = vmatprep.subr.bf16.mxu1 %v1294_v21  ;;  %v1300_v27 = vld [vmem:[%s1715_s3 + $0x90] sm:$0xff]   ;;  %v1303_v30 = vld [vmem:[%s1715_s3 + $0x8] sm:$0xff]   ;;  %v1306_v33 = vld [vmem:[%s1715_s3 + $0xc0] sm:$0xff]   ;;  %p1322_p1 = scmp.lt.s32.totalorder %s992_s25, %s992_s25 }
  0x51   :  { %v1304_v31 = vld [vmem:[%s1715_s3 + $0x88] sm:$0xff]   ;;  %v1307_v34 = vld [vmem:[%s1715_s3] sm:$0xff]   ;;  %v100_v39 = vsub.s32 0, %v99_v38  ;;  %v108_v40 = vsub.s32 2, %v99_v38  ;;  %v104_v42 = vsub.s32 1, %v99_v38  ;;  %v112_v43 = vsub.s32 3, %v99_v38 }
  0x52   :  { %v1308_v35 = vld [vmem:[%s1715_s3 + $0x80] sm:$0xff]   ;;  %v1309_v3 = vld [vmem:[%s1717_s5 + $0x38] sm:$0xff]   ;;  %v1310_v5 = vld [vmem:[%s1717_s5 + $0x30] sm:$0xff]  }
  0x53   :  { %1114 = vmatpush3.bf16.msra.mxu0 %v1295_v22  ;;  %1136 = vmatpush3.bf16.msra.mxu1 %v1296_v23  ;;  %v96_v41 = vld [vmem:[%s1714_s2] sm:$0xf]  ;;  %v1311_v6 = vld [vmem:[%s1717_s5 + $0x28] sm:$0xff]   ;;  %v1313_v8 = vld [vmem:[%s1717_s5 + $0x18] sm:$0xff]  }
  0x54   :  { %1115 = vmatprep.subr.bf16.mxu0 %v1297_v24  ;;  %1137 = vmatprep.subr.bf16.mxu1 %v1298_v25  ;;  %v101_v44 = vrot.slane %v96_v41, %v100_v39  ;;  %v109_v45 = vrot.slane %v96_v41, %v108_v40  ;;  %v105_v46 = vrot.slane %v96_v41, %v104_v42  ;;  %v1312_v7 = vld [vmem:[%s1717_s5 + $0x20] sm:$0xff]   ;;  %v1314_v9 = vld [vmem:[%s1717_s5 + $0x10] sm:$0xff]   ;;  %v1315_v10 = vld [vmem:[%s1717_s5 + $0x8] sm:$0xff]  }
  0x55   :  { %v113_v47 = vrot.slane %v96_v41, %v112_v43  ;;  %v1316_v11 = vld [vmem:[%s1717_s5] sm:$0xff]  }
  0x56   :  { %v1063_v14 = vld [vmem:[%s1716_s4] ss:$0 sm:$0xff]  ;;  %s1317_s4 = scalar_lea.vmem %s992_s25, 128 }
  0x57   :  { %1116 = vmatpush3.bf16.msra.mxu0 %v1299_v26  ;;  %1138 = vmatpush3.bf16.msra.mxu1 %v1300_v27  ;;  %v1096_v27 = vld [vmem:[%s1718_s6] ss:$0 sm:$0xff]  ;;  %p1318_p0 = scmp.ne.s32.totalorder %s992_s25, %s1317_s4  ;;  %p1323_p2 = scmp.lt.s32.totalorder %s1317_s4, %s1317_s4 }
  0x58   :  { %1117 = vmatprep.subr.bf16.mxu0 %v1301_v28  ;;  %1139 = vmatprep.subr.bf16.mxu1 %v1302_v29 }
  0x59   :  { %p1324_p3 = por %p1323_p2, %p1322_p1 }
  0x5b   :  { %1118 = vmatpush3.bf16.msra.mxu0 %v1303_v30  ;;  %1140 = vmatpush3.bf16.msra.mxu1 %v1304_v31  ;;  %p1325_p4 = pnand %p1324_p3, %p1318_p0 }
  0x5c   :  { %1119 = vmatprep.subr.bf16.mxu0 %v1305_v32  ;;  %1141 = vmatprep.subr.bf16.mxu1 %v1306_v33 }
  0x5f   :  { %1120 = vmatpush3.bf16.msra.mxu0 %v1307_v34  ;;  %1142 = vmatpush3.bf16.msra.mxu1 %v1308_v35 }
  0x60   :  { %1158 = vmatprep.subr.bf16.mxu0 %v1339_v36 }
 0x102   :  { %v472_v48 = vpop.f32.mrf.mxu0  ;;  %v513_v49 = vpop.f32.mrf.mxu1 }
 0x103   :  { %v473_v50 = vadd.f32 %v472_v48, %v101_v44  ;;  %v514_v51 = vadd.f32 %v513_v49, %v109_v45 }
 0x104   :  { %v474_v52 = vpop.f32.mrf.mxu0  ;;  %v515_v53 = vpop.f32.mrf.mxu1 }
 0x105   :  { %v522_v54 = vmax.f32 %v514_v51, 0.0  ;;  %v475_v55 = vadd.f32 %v474_v52, %v105_v46  ;;  %v516_v56 = vadd.f32 %v515_v53, %v113_v47  ;;  %v520_v57 = vmax.f32 %v473_v50, 0.0 }
 0x106   :  { %v476_v58 = vpop.f32.mrf.mxu0  ;;  %v517_v59 = vpop.f32.mrf.mxu1 }
 0x107   :  { %v521_v60 = vmax.f32 %v475_v55, 0.0  ;;  %v523_v61 = vmax.f32 %v516_v56, 0.0  ;;  %v526_v62 = vpack.c.bf16 %v522_v54, %v522_v54  ;;  %v524_v4 = vpack.c.bf16 %v520_v57, %v520_v57 }
 0x108   :  { %v477_v63 = vpop.f32.mrf.mxu0  ;;  %v518_v0 = vpop.f32.mrf.mxu1 }
 0x109   :  { %v525_v1 = vpack.c.bf16 %v521_v60, %v521_v60  ;;  %v527_v2 = vpack.c.bf16 %v523_v61, %v523_v61 }
 0x10b   :  { %823 = vmatprep.mubr.bf16.mxu0 %v525_v1  ;;  %863 = vmatprep.mubr.bf16.mxu1 %v527_v2 }
 0x10c   :  { %824 = vmatmul.mubr.bf16.vlgmr.msra.gmra.mxu0 %v524_v4  ;;  %864 = vmatmul.mubr.bf16.vlgmr.msra.gmra.mxu1 %v526_v62 }
 0x10d   :  { %1159 = vmatpush3.bf16.msra.mxu0 %v1309_v3  ;;  %1174 = vmatprep.mubr.msk.bf16.mxu0 %vm1340_vm0, %v1339_v36 }
 0x10e   :  { %1160 = vmatprep.subr.bf16.mxu0 %v1339_v36 }
 0x111   :  { %1161 = vmatpush3.bf16.msra.mxu0 %v1310_v5 }
 0x112   :  { %1162 = vmatprep.subr.bf16.mxu0 %v1339_v36 }
 0x115   :  { %1163 = vmatpush3.bf16.msra.mxu0 %v1311_v6 }
 0x116   :  { %1164 = vmatprep.subr.bf16.mxu0 %v1339_v36 }
 0x119   :  { %1165 = vmatpush3.bf16.msra.mxu0 %v1312_v7 }
 0x11a   :  { %1166 = vmatprep.subr.bf16.mxu0 %v1339_v36 }
 0x11d   :  { %1167 = vmatpush3.bf16.msra.mxu0 %v1313_v8 }
 0x11e   :  { %1168 = vmatprep.subr.bf16.mxu0 %v1339_v36 }
 0x121   :  { %1169 = vmatpush3.bf16.msra.mxu0 %v1314_v9 }
 0x122   :  { %1170 = vmatprep.subr.bf16.mxu0 %v1339_v36 }
 0x125   :  { %1171 = vmatpush3.bf16.msra.mxu0 %v1315_v10 }
 0x126   :  { %1172 = vmatprep.subr.bf16.mxu0 %v1339_v36 }
 0x129   :  { %1173 = vmatpush3.bf16.msra.mxu0 %v1316_v11 }
 0x1cc   :  { %v1121_v12 = vpop.f32.mrf.mxu0  ;;  %v1143_v13 = vpop.f32.mrf.mxu1 }
 0x1ce   :  { %v1122_v15 = vpop.f32.mrf.mxu0  ;;  %v1144_v16 = vpop.f32.mrf.mxu1 }
 0x1cf   :  { %v1123_v17 = vadd.f32 %v1122_v15, %v1121_v12  ;;  %v1145_v21 = vadd.f32 %v1144_v16, %v1143_v13 }
 0x1d0   :  { %v1124_v18 = vpop.f32.mrf.mxu0  ;;  %v1146_v19 = vpop.f32.mrf.mxu1 }
 0x1d1   :  { %v826_v20 = vadd.f32 %v1123_v17, %v1063_v14 }
 0x1d2   :  { %v1125_v22 = vpop.f32.mrf.mxu0  ;;  %v1147_v23 = vpop.f32.mrf.mxu1 }
 0x1d3   :  { %v866_v24 = vadd.f32 %v1145_v21, %v826_v20 }
 0x1d5   :  { %v871_v25 = vmax.f32 %v866_v24, 0.0 }
 0x1d7   :  { %v872_v26 = vpack.c.bf16 %v871_v25, %v871_v25 }
 0x1d9   :  { %1175 = vmatmul.mubr.bf16.vlgmr.msra.gmra.mxu0 %v872_v26 }
 0x299   :  { %v978_v28 = vpop.f32.mrf.mxu0 }
 0x29a   :  { %v979_v29 = vadd.f32 %v1096_v27, %v978_v28 }
 0x29b   :  { %v1176_v30 = vpop.f32.mrf.mxu0 }
 0x29c   :  { %984 = vst [vmem:[#allocation2] sm:$0xff] %v979_v29 }
 0x29d   :  { %v981_v31 = vpop.f32.mrf.mxu0 }
 0x29e   :  { %1328 = shalt.err (!%p1325_p4)
}
 0x29f   :  { %994 = dma.vmem_to_hbm [thread:$0]  %s992_s25, 128, %s1719_s7, [#allocation3]   ;;  %v1177_v32 = vpop.f32.mrf.mxu0 }
 0x2a0   :  { %1337 = dma.done.wait [#allocation3], 128  }
 0x2a1   :  { %1338 = vsyncadd [#allocation3], 4294967168 }
 0x2a2   :  { %998 = vsyncpa [#allocation3], 1 }

</bundles_post_ra>
